<compile_context>
chip_gen: v7x
topology: tpu7x:2x2x1
jax: 0.10.0
libtpu: 0.0.40
codegen_flags: <defaults>
</compile_context>

<pallas_src>
import numpy as np
import jax
import jax.numpy as jnp
from jax.experimental import pallas as pl
from jax.experimental.pallas import tpu as pltpu


def _round_up(x, m):
    return (x + m - 1) // m * m


def _vmem_limit_bytes():
    # Generation-aware scoped-VMEM budget: ~100 MiB on 128-MiB chips (v5e/v6e),
    # ~48 MiB on v7x (64 MiB physical).  Conservative fallback if the query fails.
    cap = 64 * 1024 * 1024
    try:
        cap = int(pltpu.get_tpu_info().vmem_capacity_bytes)
    except Exception:
        pass
    return max(32 * 1024 * 1024, min(cap - 16 * 1024 * 1024, 100 * 1024 * 1024))


_VMEM_LIMIT = _vmem_limit_bytes()


# ----------------------------- Pallas kernels -----------------------------

def _conv3x3s2_kernel(x_ref, w_ref, b_ref, o_ref):
    """3x3 / stride-2 / pad-1 conv over one image's four stride-2 phase planes.

    x_ref: (2, 2, Hh, Whp, C)  bf16 -- phase planes (ph, pw) of the padded image
    w_ref: (9, C, Wcols)       bf16 -- per-tap weights; Wcols is the per-step
                                       block (t_cout) or the full, VMEM-resident
                                       Cout_p (then sliced by program_id(1) here)
    b_ref: (1, t_cout)         f32
    o_ref: (Ho * Wo_p, t_cout) output dtype
    """
    _, _, Hh, Whp, C = x_ref.shape
    Ho, Wop = Hh - 1, Whp - 1
    t_cout = o_ref.shape[-1]
    w_is_full = w_ref.shape[-1] != t_cout
    col0 = pl.multiple_of(pl.program_id(1) * t_cout, t_cout)

    # Hoist the sublane-unaligned 1-column shift of the two pw=0 phases so the
    # relayout happens once per phase instead of once per kw==2 tap.
    x_shift = [x_ref[ph, 0, :, 1:, :] for ph in range(2)]   # (Hh, Wop, C) each

    acc = jnp.zeros(o_ref.shape, jnp.float32)
    for kh in range(3):
        ph, dh = kh % 2, kh // 2
        for kw in range(3):
            pw, dw = kw % 2, kw // 2
            if dw:                                   # kw == 2: pre-shifted plane
                lhs = x_shift[ph][dh:dh + Ho]
            else:                                    # aligned slice off VMEM
                lhs = x_ref[ph, pw, dh:dh + Ho, 0:Wop, :]
            lhs = lhs.reshape(Ho * Wop, C)           # pure re-tiling: Wop % 8 == 0
            tap = 3 * kh + kw
            if w_is_full:
                rhs = w_ref[tap, :, pl.ds(col0, t_cout)]
            else:
                rhs = w_ref[tap]
            acc = acc + jnp.dot(lhs, rhs, preferred_element_type=jnp.float32)
    o_ref[...] = (acc + b_ref[...]).astype(o_ref.dtype)


def _avgpool_kernel(x_ref, s_ref, o_ref):
    # x_ref: (tr, 4*g*Wo)   -- g pooling bands (2 input rows each) per row
    # s_ref: (4*g*Wo, g*Wo) -- 0.25-weighted 2x2 pooling matrix (4 taps / column)
    # o_ref: (tr, g*Wo)     -- lane-dense pooled rows
    o_ref[...] = jnp.dot(x_ref[...], s_ref[...],
                         preferred_element_type=jnp.float32).astype(o_ref.dtype)


# ------------------------------- wrappers ---------------------------------

@jax.jit
def downsample_conv2d(x, w, b):
    """x: (N, C, H, W); w: (Cout, Cin, 3, 3); b: (Cout,).  stride=2, pad=1."""
    N, C, H, W = x.shape
    Cout = w.shape[0]
    Ho = (H - 1) // 2 + 1
    Wo = (W - 1) // 2 + 1
    Wo_p = _round_up(Wo, 8)           # tile-aligned padded output width
    Hh, Wh = Ho + 1, Wo_p + 1         # phase-plane spatial extents
    Cout_p = _round_up(Cout, 128)     # lane-dense output channels
    # 256 matches the 2x256^2 MXU on v6e/v7x; on v5e (4x128^2) it is simply two
    # passes per push, still correct and cheap.
    t_cout = 256 if Cout_p % 256 == 0 else 128
    M = Ho * Wo_p
    J = Cout_p // t_cout

    # --- fused prep: ONE pad + ONE transpose, already in bf16 -----------------
    xb = x.astype(jnp.bfloat16)
    pad_b = 2 * Hh - 1 - H
    pad_r = 2 * Wh - 1 - W
    xp = jnp.pad(xb, ((0, 0), (0, 0), (1, pad_b), (1, pad_r)))        # (N,C,2Hh,2Wh)
    xph = xp.reshape(N, C, Hh, 2, Wh, 2).transpose(0, 3, 5, 2, 4, 1)  # (N,2,2,Hh,Wh,C)

    # weights -> (9, Cin, Cout_p) bf16 (tap = 3*kh + kw); bias -> (1, Cout_p) f32
    wt = jnp.transpose(w, (2, 3, 1, 0)).reshape(9, C, Cout).astype(jnp.bfloat16)
    wt = jnp.pad(wt, ((0, 0), (0, 0), (0, Cout_p - Cout)))
    bt = jnp.pad(b.astype(jnp.float32), (0, Cout_p - Cout)).reshape(1, Cout_p)

    # Keep the whole weight tensor VMEM-resident (constant block index => DMA'd
    # exactly once instead of N*J times) whenever it is small enough.
    w_resident = wt.size * 2 <= 8 * 1024 * 1024
    if w_resident:
        w_spec = pl.BlockSpec((9, C, Cout_p), lambda n, j: (0, 0, 0))
    else:
        w_spec = pl.BlockSpec((9, C, t_cout), lambda n, j: (0, 0, j))

    out_itemsize = jnp.dtype(x.dtype).itemsize
    cost = pl.CostEstimate(
        flops=2 * N * M * 9 * C * Cout_p,
        transcendentals=0,
        bytes_accessed=(xph.size * 2
                        + wt.size * 2 * (1 if w_resident else N)
                        + bt.size * 4
                        + N * M * Cout_p * out_itemsize))

    out = pl.pallas_call(
        _conv3x3s2_kernel,
        out_shape=jax.ShapeDtypeStruct((N, M, Cout_p), x.dtype),
        grid=(N, J),
        in_specs=[
            # Activation block index depends only on n, so it is not re-fetched
            # across the inner ("arbitrary") cout axis.
            pl.BlockSpec((None, 2, 2, Hh, Wh, C), lambda n, j: (n, 0, 0, 0, 0, 0)),
            w_spec,
            pl.BlockSpec((1, t_cout), lambda n, j: (0, j)),
        ],
        out_specs=pl.BlockSpec((None, M, t_cout), lambda n, j: (n, 0, j)),
        compiler_params=pltpu.CompilerParams(
            dimension_semantics=("parallel", "arbitrary"),
            vmem_limit_bytes=_VMEM_LIMIT),
        cost_estimate=cost,
    )(xph, wt, bt)

    out = out[:, :, :Cout].reshape(N, Ho, Wo_p, Cout)[:, :, :Wo, :]
    return jnp.transpose(out, (0, 3, 1, 2))     # back to NCHW


def _pick_bands_per_row(R, Wo, lo=128, hi=1024):
    """Smallest divisor g of R with lo <= g*Wo <= hi (lane-dense output rows);
    falls back to the largest divisor with g*Wo < lo."""
    fallback = 1
    g = 1
    while g <= R and g * Wo <= hi:
        if R % g == 0:
            if g * Wo >= lo:
                return g
            fallback = g
        g += 1
    return fallback


@jax.jit
def downsample_avgpool2d(x):
    """x: (N, C, H, W) -> (N, C, H//2, W//2); AvgPool2d(2, stride=2), native dtype."""
    N, C, H, W = x.shape
    Ho, Wo = H // 2, W // 2            # PyTorch semantics: odd tail rows/cols dropped
    xs = x[:, :, :2 * Ho, :2 * Wo]     # keep native dtype (kernel is mem-bound)
    R = N * C * Ho                     # number of 2-row pooling bands

    # Pack g bands per row so the output row (g*Wo) is lane-dense even when Wo<128.
    g = _pick_bands_per_row(R, Wo)
    Rg = R // g
    Lin, Lout = 4 * g * Wo, g * Wo
    xr = xs.reshape(Rg, Lin)           # free, contiguous reshape (no HBM transpose)

    # 0.25-weighted 2x2 pooling matrix: 4 input taps per output column.  The
    # matmul performs the vertical AND horizontal pair-sums, so there is no
    # lane-misaligned split inside the kernel; the MXU is idle here anyway.
    S = np.zeros((Lin, Lout), np.float32)
    cols = np.arange(Lout)
    band, wo = cols // Wo, cols % Wo
    base = band * (4 * Wo)
    for off in (2 * wo, 2 * wo + 1, 2 * Wo + 2 * wo, 2 * Wo + 2 * wo + 1):
        S[base + off, cols] = 0.25
    S = jnp.asarray(S, dtype=x.dtype)

    # VMEM-budget-driven row tile (double-buffered in+out blocks), generation aware.
    row_bytes = (Lin + Lout) * jnp.dtype(x.dtype).itemsize
    block_budget = min(_VMEM_LIMIT // 4, 12 * 1024 * 1024)
    tr = max(8, min((block_budget // (2 * row_bytes)) // 8 * 8, 4096))
    tr = min(tr, _round_up(Rg, 8))
    Rg_p = _round_up(Rg, tr)
    if Rg_p != Rg:
        xr = jnp.pad(xr, ((0, Rg_p - Rg), (0, 0)))

    out = pl.pallas_call(
        _avgpool_kernel,
        out_shape=jax.ShapeDtypeStruct((Rg_p, Lout), x.dtype),
        grid=(Rg_p // tr,),
        in_specs=[pl.BlockSpec((tr, Lin), lambda i: (i, 0)),
                  pl.BlockSpec((Lin, Lout), lambda i: (0, 0))],
        out_specs=pl.BlockSpec((tr, Lout), lambda i: (i, 0)),
        compiler_params=pltpu.CompilerParams(
            dimension_semantics=("parallel",),
            vmem_limit_bytes=_VMEM_LIMIT),
    )(xr, S)

    return out[:Rg].reshape(N, C, Ho, Wo)


class DownsamplePallas:
    """Mirror of the PyTorch Downsample module (dims=2)."""

    def __init__(self, channels, use_conv, out_channels=None, padding=1, key=None):
        assert padding == 1
        self.channels = channels
        self.out_channels = out_channels or channels
        self.use_conv = use_conv
        if use_conv:
            key = key if key is not None else jax.random.PRNGKey(0)
            kw, kb = jax.random.split(key)
            fan_in = channels * 9
            bound = 1.0 / (fan_in ** 0.5)
            self.w = jax.random.uniform(
                kw, (self.out_channels, channels, 3, 3), jnp.float32, -bound, bound)
            self.b = jax.random.uniform(
                kb, (self.out_channels,), jnp.float32, -bound, bound)
        else:
            assert self.channels == self.out_channels

    def __call__(self, x):
        assert x.shape[1] == self.channels
        if self.use_conv:
            return downsample_conv2d(x, self.w, self.b)
        return downsample_avgpool2d(x)


# ------------------------------- references -------------------------------

def _conv_ref(x, w, b):
    y = jax.lax.conv_general_dilated(
        x, w, window_strides=(2, 2), padding=((1, 1), (1, 1)),
        dimension_numbers=("NCHW", "OIHW", "NCHW"))
    return y + b[None, :, None, None]


def _pool_ref(x):
    N, C, H, W = x.shape
    return x.reshape(N, C, H // 2, 2, W // 2, 2).mean(axis=(3, 5))


if __name__ == "__main__":
    key = jax.random.PRNGKey(0)
    kx, kp = jax.random.split(key)
    x = jax.random.normal(kx, (2, 4, 16, 16), dtype=jnp.float32)

    # use_conv=True path (bf16 matmuls with f32 accumulation -> loosened tolerance)
    mod_conv = DownsamplePallas(channels=4, use_conv=True, out_channels=4, key=kp)
    y_conv = jax.block_until_ready(mod_conv(x))
    y_conv_ref = _conv_ref(x, mod_conv.w, mod_conv.b)
    assert y_conv.shape == (2, 4, 8, 8)
    assert jnp.allclose(y_conv, y_conv_ref, atol=3e-2, rtol=3e-2), "conv mismatch"

    # use_conv=False path (avg pool, native dtype)
    mod_pool = DownsamplePallas(channels=4, use_conv=False)
    y_pool = jax.block_until_ready(mod_pool(x))
    y_pool_ref = _pool_ref(x)
    assert y_pool.shape == (2, 4, 8, 8)
    assert jnp.allclose(y_pool, y_pool_ref, atol=1e-5, rtol=1e-5), "pool mismatch"

    print("KERNEL_OK")
</pallas_src>

<mosaic_0001>
module attributes {stable_mosaic.version = 11 : i64} {
  func.func @_conv3x3s2_kernel(%arg0: i32, %arg1: i32, %arg2: memref<1x2x2x9x9x4xbf16, #tpu.memory_space<vmem>>, %arg3: memref<9x4x128xbf16, #tpu.memory_space<vmem>>, %arg4: memref<1x128xf32, #tpu.memory_space<vmem>>, %arg5: memref<1x64x128xf32, #tpu.memory_space<vmem>>) attributes {dimension_semantics = [#tpu.dimension_semantics<parallel>, #tpu.dimension_semantics<arbitrary>], iteration_bounds = array<i64: 2, 1>, scalar_prefetch = 0 : i64, scratch_operands = 0 : i64, tpu.core_type = #tpu.core_type<tc>, window_params = [{transform_indices = @transform_0, window_bounds = array<i64: 1, 2, 2, 9, 9, 4>}, {pipeline_mode = #tpu.pipeline_mode<synchronous>, transform_indices = @transform_1, window_bounds = array<i64: 9, 4, 128>}, {transform_indices = @transform_2, window_bounds = array<i64: 1, 128>}, {transform_indices = @transform_3, window_bounds = array<i64: 1, 64, 128>}]} {
    %c0 = arith.constant 0 : index
    %c0_0 = arith.constant 0 : index
    %c0_1 = arith.constant 0 : index
    %c0_2 = arith.constant 0 : index
    %c1 = arith.constant 1 : index
    %c0_3 = arith.constant 0 : index
    %0 = vector.load %arg2[%c0, %c0_0, %c0_1, %c0_2, %c1, %c0_3] : memref<1x2x2x9x9x4xbf16, #tpu.memory_space<vmem>>, vector<1x1x1x9x8x4xbf16>
    %1 = vector.shape_cast %0 : vector<1x1x1x9x8x4xbf16> to vector<9x8x4xbf16>
    %c0_4 = arith.constant 0 : index
    %c1_5 = arith.constant 1 : index
    %c0_6 = arith.constant 0 : index
    %c0_7 = arith.constant 0 : index
    %c1_8 = arith.constant 1 : index
    %c0_9 = arith.constant 0 : index
    %2 = vector.load %arg2[%c0_4, %c1_5, %c0_6, %c0_7, %c1_8, %c0_9] : memref<1x2x2x9x9x4xbf16, #tpu.memory_space<vmem>>, vector<1x1x1x9x8x4xbf16>
    %3 = vector.shape_cast %2 : vector<1x1x1x9x8x4xbf16> to vector<9x8x4xbf16>
    %cst = arith.constant 0.000000e+00 : f32
    %4 = vector.broadcast %cst : f32 to vector<64x128xf32>
    %c0_10 = arith.constant 0 : index
    %c0_11 = arith.constant 0 : index
    %c0_12 = arith.constant 0 : index
    %c0_13 = arith.constant 0 : index
    %c0_14 = arith.constant 0 : index
    %c0_15 = arith.constant 0 : index
    %5 = vector.load %arg2[%c0_10, %c0_11, %c0_12, %c0_13, %c0_14, %c0_15] : memref<1x2x2x9x9x4xbf16, #tpu.memory_space<vmem>>, vector<1x1x1x8x8x4xbf16>
    %6 = vector.shape_cast %5 : vector<1x1x1x8x8x4xbf16> to vector<8x8x4xbf16>
    %7 = vector.shape_cast %6 : vector<8x8x4xbf16> to vector<64x4xbf16>
    %c0_16 = arith.constant 0 : index
    %c0_17 = arith.constant 0 : index
    %c0_18 = arith.constant 0 : index
    %8 = vector.load %arg3[%c0_16, %c0_17, %c0_18] : memref<9x4x128xbf16, #tpu.memory_space<vmem>>, vector<1x4x128xbf16>
    %9 = vector.shape_cast %8 : vector<1x4x128xbf16> to vector<4x128xbf16>
    %cst_19 = arith.constant dense<0.000000e+00> : vector<64x128xf32>
    %10 = tpu.matmul %7, %9, %cst_19 {dimension_numbers = #tpu.dot_dimension_numbers<[1], [0], [0], [1], [0, 0, 1, 1], [], []>} : vector<64x4xbf16>, vector<4x128xbf16>, vector<64x128xf32> -> vector<64x128xf32>
    %11 = arith.addf %4, %10 : vector<64x128xf32>
    %c0_20 = arith.constant 0 : index
    %c0_21 = arith.constant 0 : index
    %c1_22 = arith.constant 1 : index
    %c0_23 = arith.constant 0 : index
    %c0_24 = arith.constant 0 : index
    %c0_25 = arith.constant 0 : index
    %12 = vector.load %arg2[%c0_20, %c0_21, %c1_22, %c0_23, %c0_24, %c0_25] : memref<1x2x2x9x9x4xbf16, #tpu.memory_space<vmem>>, vector<1x1x1x8x8x4xbf16>
    %13 = vector.shape_cast %12 : vector<1x1x1x8x8x4xbf16> to vector<8x8x4xbf16>
    %14 = vector.shape_cast %13 : vector<8x8x4xbf16> to vector<64x4xbf16>
    %c1_26 = arith.constant 1 : index
    %c0_27 = arith.constant 0 : index
    %c0_28 = arith.constant 0 : index
    %15 = vector.load %arg3[%c1_26, %c0_27, %c0_28] : memref<9x4x128xbf16, #tpu.memory_space<vmem>>, vector<1x4x128xbf16>
    %16 = vector.shape_cast %15 : vector<1x4x128xbf16> to vector<4x128xbf16>
    %cst_29 = arith.constant dense<0.000000e+00> : vector<64x128xf32>
    %17 = tpu.matmul %14, %16, %cst_29 {dimension_numbers = #tpu.dot_dimension_numbers<[1], [0], [0], [1], [0, 0, 1, 1], [], []>} : vector<64x4xbf16>, vector<4x128xbf16>, vector<64x128xf32> -> vector<64x128xf32>
    %18 = arith.addf %11, %17 : vector<64x128xf32>
    %19 = vector.extract_strided_slice %1 {offsets = [0, 0, 0], sizes = [8, 8, 4], strides = [1, 1, 1]} : vector<9x8x4xbf16> to vector<8x8x4xbf16>
    %20 = vector.shape_cast %19 : vector<8x8x4xbf16> to vector<64x4xbf16>
    %c2 = arith.constant 2 : index
    %c0_30 = arith.constant 0 : index
    %c0_31 = arith.constant 0 : index
    %21 = vector.load %arg3[%c2, %c0_30, %c0_31] : memref<9x4x128xbf16, #tpu.memory_space<vmem>>, vector<1x4x128xbf16>
    %22 = vector.shape_cast %21 : vector<1x4x128xbf16> to vector<4x128xbf16>
    %cst_32 = arith.constant dense<0.000000e+00> : vector<64x128xf32>
    %23 = tpu.matmul %20, %22, %cst_32 {dimension_numbers = #tpu.dot_dimension_numbers<[1], [0], [0], [1], [0, 0, 1, 1], [], []>} : vector<64x4xbf16>, vector<4x128xbf16>, vector<64x128xf32> -> vector<64x128xf32>
    %24 = arith.addf %18, %23 : vector<64x128xf32>
    %c0_33 = arith.constant 0 : index
    %c1_34 = arith.constant 1 : index
    %c0_35 = arith.constant 0 : index
    %c0_36 = arith.constant 0 : index
    %c0_37 = arith.constant 0 : index
    %c0_38 = arith.constant 0 : index
    %25 = vector.load %arg2[%c0_33, %c1_34, %c0_35, %c0_36, %c0_37, %c0_38] : memref<1x2x2x9x9x4xbf16, #tpu.memory_space<vmem>>, vector<1x1x1x8x8x4xbf16>
    %26 = vector.shape_cast %25 : vector<1x1x1x8x8x4xbf16> to vector<8x8x4xbf16>
    %27 = vector.shape_cast %26 : vector<8x8x4xbf16> to vector<64x4xbf16>
    %c3 = arith.constant 3 : index
    %c0_39 = arith.constant 0 : index
    %c0_40 = arith.constant 0 : index
    %28 = vector.load %arg3[%c3, %c0_39, %c0_40] : memref<9x4x128xbf16, #tpu.memory_space<vmem>>, vector<1x4x128xbf16>
    %29 = vector.shape_cast %28 : vector<1x4x128xbf16> to vector<4x128xbf16>
    %cst_41 = arith.constant dense<0.000000e+00> : vector<64x128xf32>
    %30 = tpu.matmul %27, %29, %cst_41 {dimension_numbers = #tpu.dot_dimension_numbers<[1], [0], [0], [1], [0, 0, 1, 1], [], []>} : vector<64x4xbf16>, vector<4x128xbf16>, vector<64x128xf32> -> vector<64x128xf32>
    %31 = arith.addf %24, %30 : vector<64x128xf32>
    %c0_42 = arith.constant 0 : index
    %c1_43 = arith.constant 1 : index
    %c1_44 = arith.constant 1 : index
    %c0_45 = arith.constant 0 : index
    %c0_46 = arith.constant 0 : index
    %c0_47 = arith.constant 0 : index
    %32 = vector.load %arg2[%c0_42, %c1_43, %c1_44, %c0_45, %c0_46, %c0_47] : memref<1x2x2x9x9x4xbf16, #tpu.memory_space<vmem>>, vector<1x1x1x8x8x4xbf16>
    %33 = vector.shape_cast %32 : vector<1x1x1x8x8x4xbf16> to vector<8x8x4xbf16>
    %34 = vector.shape_cast %33 : vector<8x8x4xbf16> to vector<64x4xbf16>
    %c4 = arith.constant 4 : index
    %c0_48 = arith.constant 0 : index
    %c0_49 = arith.constant 0 : index
    %35 = vector.load %arg3[%c4, %c0_48, %c0_49] : memref<9x4x128xbf16, #tpu.memory_space<vmem>>, vector<1x4x128xbf16>
    %36 = vector.shape_cast %35 : vector<1x4x128xbf16> to vector<4x128xbf16>
    %cst_50 = arith.constant dense<0.000000e+00> : vector<64x128xf32>
    %37 = tpu.matmul %34, %36, %cst_50 {dimension_numbers = #tpu.dot_dimension_numbers<[1], [0], [0], [1], [0, 0, 1, 1], [], []>} : vector<64x4xbf16>, vector<4x128xbf16>, vector<64x128xf32> -> vector<64x128xf32>
    %38 = arith.addf %31, %37 : vector<64x128xf32>
    %39 = vector.extract_strided_slice %3 {offsets = [0, 0, 0], sizes = [8, 8, 4], strides = [1, 1, 1]} : vector<9x8x4xbf16> to vector<8x8x4xbf16>
    %40 = vector.shape_cast %39 : vector<8x8x4xbf16> to vector<64x4xbf16>
    %c5 = arith.constant 5 : index
    %c0_51 = arith.constant 0 : index
    %c0_52 = arith.constant 0 : index
    %41 = vector.load %arg3[%c5, %c0_51, %c0_52] : memref<9x4x128xbf16, #tpu.memory_space<vmem>>, vector<1x4x128xbf16>
    %42 = vector.shape_cast %41 : vector<1x4x128xbf16> to vector<4x128xbf16>
    %cst_53 = arith.constant dense<0.000000e+00> : vector<64x128xf32>
    %43 = tpu.matmul %40, %42, %cst_53 {dimension_numbers = #tpu.dot_dimension_numbers<[1], [0], [0], [1], [0, 0, 1, 1], [], []>} : vector<64x4xbf16>, vector<4x128xbf16>, vector<64x128xf32> -> vector<64x128xf32>
    %44 = arith.addf %38, %43 : vector<64x128xf32>
    %c0_54 = arith.constant 0 : index
    %c0_55 = arith.constant 0 : index
    %c0_56 = arith.constant 0 : index
    %c1_57 = arith.constant 1 : index
    %c0_58 = arith.constant 0 : index
    %c0_59 = arith.constant 0 : index
    %45 = vector.load %arg2[%c0_54, %c0_55, %c0_56, %c1_57, %c0_58, %c0_59] : memref<1x2x2x9x9x4xbf16, #tpu.memory_space<vmem>>, vector<1x1x1x8x8x4xbf16>
    %46 = vector.shape_cast %45 : vector<1x1x1x8x8x4xbf16> to vector<8x8x4xbf16>
    %47 = vector.shape_cast %46 : vector<8x8x4xbf16> to vector<64x4xbf16>
    %c6 = arith.constant 6 : index
    %c0_60 = arith.constant 0 : index
    %c0_61 = arith.constant 0 : index
    %48 = vector.load %arg3[%c6, %c0_60, %c0_61] : memref<9x4x128xbf16, #tpu.memory_space<vmem>>, vector<1x4x128xbf16>
    %49 = vector.shape_cast %48 : vector<1x4x128xbf16> to vector<4x128xbf16>
    %cst_62 = arith.constant dense<0.000000e+00> : vector<64x128xf32>
    %50 = tpu.matmul %47, %49, %cst_62 {dimension_numbers = #tpu.dot_dimension_numbers<[1], [0], [0], [1], [0, 0, 1, 1], [], []>} : vector<64x4xbf16>, vector<4x128xbf16>, vector<64x128xf32> -> vector<64x128xf32>
    %51 = arith.addf %44, %50 : vector<64x128xf32>
    %c0_63 = arith.constant 0 : index
    %c0_64 = arith.constant 0 : index
    %c1_65 = arith.constant 1 : index
    %c1_66 = arith.constant 1 : index
    %c0_67 = arith.constant 0 : index
    %c0_68 = arith.constant 0 : index
    %52 = vector.load %arg2[%c0_63, %c0_64, %c1_65, %c1_66, %c0_67, %c0_68] : memref<1x2x2x9x9x4xbf16, #tpu.memory_space<vmem>>, vector<1x1x1x8x8x4xbf16>
    %53 = vector.shape_cast %52 : vector<1x1x1x8x8x4xbf16> to vector<8x8x4xbf16>
    %54 = vector.shape_cast %53 : vector<8x8x4xbf16> to vector<64x4xbf16>
    %c7 = arith.constant 7 : index
    %c0_69 = arith.constant 0 : index
    %c0_70 = arith.constant 0 : index
    %55 = vector.load %arg3[%c7, %c0_69, %c0_70] : memref<9x4x128xbf16, #tpu.memory_space<vmem>>, vector<1x4x128xbf16>
    %56 = vector.shape_cast %55 : vector<1x4x128xbf16> to vector<4x128xbf16>
    %cst_71 = arith.constant dense<0.000000e+00> : vector<64x128xf32>
    %57 = tpu.matmul %54, %56, %cst_71 {dimension_numbers = #tpu.dot_dimension_numbers<[1], [0], [0], [1], [0, 0, 1, 1], [], []>} : vector<64x4xbf16>, vector<4x128xbf16>, vector<64x128xf32> -> vector<64x128xf32>
    %58 = arith.addf %51, %57 : vector<64x128xf32>
    %59 = vector.extract_strided_slice %1 {offsets = [1, 0, 0], sizes = [8, 8, 4], strides = [1, 1, 1]} : vector<9x8x4xbf16> to vector<8x8x4xbf16>
    %60 = vector.shape_cast %59 : vector<8x8x4xbf16> to vector<64x4xbf16>
    %c8 = arith.constant 8 : index
    %c0_72 = arith.constant 0 : index
    %c0_73 = arith.constant 0 : index
    %61 = vector.load %arg3[%c8, %c0_72, %c0_73] : memref<9x4x128xbf16, #tpu.memory_space<vmem>>, vector<1x4x128xbf16>
    %62 = vector.shape_cast %61 : vector<1x4x128xbf16> to vector<4x128xbf16>
    %cst_74 = arith.constant dense<0.000000e+00> : vector<64x128xf32>
    %63 = tpu.matmul %60, %62, %cst_74 {dimension_numbers = #tpu.dot_dimension_numbers<[1], [0], [0], [1], [0, 0, 1, 1], [], []>} : vector<64x4xbf16>, vector<4x128xbf16>, vector<64x128xf32> -> vector<64x128xf32>
    %64 = arith.addf %58, %63 : vector<64x128xf32>
    %c0_75 = arith.constant 0 : index
    %c0_76 = arith.constant 0 : index
    %65 = vector.load %arg4[%c0_75, %c0_76] : memref<1x128xf32, #tpu.memory_space<vmem>>, vector<1x128xf32>
    %66 = vector.broadcast %65 : vector<1x128xf32> to vector<64x128xf32>
    %67 = arith.addf %64, %66 : vector<64x128xf32>
    %c0_77 = arith.constant 0 : index
    %c0_78 = arith.constant 0 : index
    %c0_79 = arith.constant 0 : index
    %68 = vector.load %arg5[%c0_77, %c0_78, %c0_79] : memref<1x64x128xf32, #tpu.memory_space<vmem>>, vector<1x64x128xf32>
    %69 = vector.shape_cast %68 : vector<1x64x128xf32> to vector<64x128xf32>
    %70 = vector.shape_cast %67 : vector<64x128xf32> to vector<1x64x128xf32>
    tpu.vector_store %arg5[%c0_77, %c0_78, %c0_79], %70 {strides = array<i32>} : memref<1x64x128xf32, #tpu.memory_space<vmem>>, vector<1x64x128xf32>,
    return
  }
  func.func @transform_0(%arg0: i32, %arg1: i32) -> (i32, i32, i32, i32, i32, i32) {
    %c0_i32 = arith.constant 0 : i32
    %c0_i32_0 = arith.constant 0 : i32
    %c0_i32_1 = arith.constant 0 : i32
    %c0_i32_2 = arith.constant 0 : i32
    %c0_i32_3 = arith.constant 0 : i32
    %c0_i32_4 = arith.constant 0 : i32
    return %arg0, %c0_i32, %c0_i32_0, %c0_i32_1, %c0_i32_2, %c0_i32_3 : i32, i32, i32, i32, i32, i32
  }
  func.func @transform_1(%arg0: i32, %arg1: i32) -> (i32, i32, i32) {
    %c0_i32 = arith.constant 0 : i32
    %c0_i32_0 = arith.constant 0 : i32
    %c0_i32_1 = arith.constant 0 : i32
    %c0_i32_2 = arith.constant 0 : i32
    return %c0_i32, %c0_i32_0, %c0_i32_1 : i32, i32, i32
  }
  func.func @transform_2(%arg0: i32, %arg1: i32) -> (i32, i32) {
    %c0_i32 = arith.constant 0 : i32
    %c0_i32_0 = arith.constant 0 : i32
    return %c0_i32, %arg1 : i32, i32
  }
  func.func @transform_3(%arg0: i32, %arg1: i32) -> (i32, i32, i32) {
    %c0_i32 = arith.constant 0 : i32
    %c0_i32_0 = arith.constant 0 : i32
    return %arg0, %c0_i32, %arg1 : i32, i32, i32
  }
}

</mosaic_0001>

<bundles_post_ra>
// kernel: downsample_conv2d.1
= control target key start
LH: loop header
LB: loop body
LE: loop exit
PB: predicated region body
PF: predicated region fallthrough
CT: control target
= control target key end

     0   :  { %s2036_s12 = smov 0   ;;  %s2038_s13 = smov 0   ;;  %s2327_s0 = inlined_call_operand.vmem [shape: bf16[2,2,2,9,9,4], index: 0, kind: input, shape index: {}]   ;;  %s2328_s1 = inlined_call_operand.vmem [shape: bf16[9,4,128], index: 1, kind: input, shape index: {}]   ;;  %s2329_s2 = inlined_call_operand.vmem [shape: f32[1,128], index: 2, kind: input, shape index: {}]   ;;  %s2330_s3 = inlined_call_operand.vmem [shape: f32[2,64,128], index: 3, kind: output, shape index: {}]  }
   0x1   :  { %s2040_s14 = smov 0  }
   0x2 LB: > { %s25_s15 = sadd.s32 1, %s2010_s13  ;;  %p1588_p0 = scmp.ge.s32.totalorder %s2014_s14, 1  ;;  %s2014_s14 = sphi %s2040_s14, %s13_s14   ;;  %s2010_s13 = sphi %s2038_s13, %s2334_s13   ;;  %s2006_s12 = sphi %s2036_s12, %s2333_s12  }
   0x3   : > { %p27_p1 = scmp.ge.s32.totalorder %s25_s15, 2  ;;  %p159_p2 = scmp.lt.s32.totalorder %s2014_s14, 3 }
   0x5   : > { %s2336_s15 = smov (%p27_p1, %s25_s15), 0  ;;  %p160_p3 = pnand %p1588_p0, %p159_p2 }
   0x6   : > { %v1616_v0 = vld [vmem:[%s2328_s1 + $0x2] sm:$0x3] (!%p160_p3)  ;;  %vm286_vm0 = vcmask (!%p160_p3), 1041408   ;;  %v2060_v1 = vld [vmem:[%s2328_s1 + $0x8] sm:$0x3] (!%p160_p3)  ;;  %p189_p4 = scmp.lt.s32.totalorder (!%p160_p3), %s2006_s12, 1 }
   0x7   : > { %163 = sbr.rel (%p160_p3) target bundleno = 320 (0x140), region = 32  ;;  %1933 = vmatprep.subr.msk.bf16.mxu1 (!%p160_p3), %vm286_vm0, %v1616_v0  ;;  %1937 = vmatprep.subr.msk.bf16.mxu0 (!%p160_p3), %vm286_vm0, %v2060_v1  ;;  %v288_v2 = vsel (!%p160_p3), %vm286_vm0, %v1616_v0, 0  ;;  %v2068_v3 = vsel (!%p160_p3), %vm286_vm0, %v2060_v1, 0  ;;  %v241_v4 = vld [vmem:[%s2328_s1] sm:$0x3] (!%p160_p3)  ;;  %vm273_vm1 = vcmask (!%p160_p3), 31744  }
   0x8   : > { %1778 = vmatpush3.bf16.msra.mxu1 (!%p160_p3), %v288_v2  ;;  %1818 = vmatpush3.bf16.msra.mxu0 (!%p160_p3), %v2068_v3  ;;  %v1676_v5 = vld [vmem:[%s2328_s1 + $0xa] sm:$0x3] (!%p160_p3)  ;;  %v388_v6 = vsel (!%p160_p3), %vm286_vm0, %v241_v4, 0  ;;  %v1693_v9 = vld [vmem:[%s2328_s1 + $0xc] sm:$0x3] (!%p160_p3) }
   0x9   : > { %1934 = vmatprep.subr.msk.bf16.mxu1 (!%p160_p3), %vm286_vm0, %v241_v4  ;;  %1939 = vmatprep.subr.msk.bf16.mxu0 (!%p160_p3), %vm286_vm0, %v1676_v5  ;;  %v1048_v7 = vsel (!%p160_p3), %vm286_vm0, %v1676_v5, 0  ;;  %v1633_v10 = vld [vmem:[%s2328_s1 + $0x4] sm:$0x3] (!%p160_p3)  ;;  %vm455_vm2 = vsmask.f32 (!%p160_p3), 3328  ;;  %v2105_v15 = vsel (!%p160_p3), %vm286_vm0, %v1693_v9, 0 }
   0xa   : > { %vm456_vm3 = vsmask.f32 (!%p160_p3), 7440  ;;  %v2108_v16 = vsel (!%p160_p3), %vm286_vm0, %v1633_v10, 0 }
   0xb   : > { %vm2126_vm4 = vmor (!%p160_p3), %vm455_vm2, %vm456_vm3 }
   0xe   : > { %s2338_s12 = smov (!%p189_p4, %s2006_s12), 1 }
   0xf   : > { %s1943_s24 = smul.u32 288, %s2338_s12  ;;  %s1731_s11 = sshll.u32 %s2338_s12, 6 }
  0x10   : > { %s2308_s20 = scalar_lea.vmem %s2330_s3, %s1731_s11 }
  0x11   : > { %s2085_s27 = scalar_lea.vmem %s2327_s0, %s1943_s24 }
  0x12   : > { %v1968_v8 = vld [vmem:[%s2085_s27 + $0x48] ss:$8 sps:$4 sm:$0xff]   ;;  %v1969_v11 = vld [vmem:[%s2085_s27 + $0xd8] ss:$8 sps:$4 sm:$0xff]   ;;  %v1593_v19 = vld [vmem:[%s2085_s27 + $0x94] sm:$0x1] }
  0x13   : > { %1779 = vmatprep.mubr.msk.bf16.mxu1 %vm273_vm1, %v1968_v8  ;;  %v1970_v12 = vld [vmem:[%s2085_s27 + $0x58] ss:$8 sps:$4 sm:$0xff]   ;;  %1819 = vmatprep.mubr.msk.bf16.mxu0 %vm273_vm1, %v1969_v11  ;;  %v1971_v13 = vld [vmem:[%s2085_s27 + $0xe8] ss:$8 sps:$4 sm:$0xff]   ;;  %v1595_v21 = vld [vmem:[%s2085_s27 + $0x9c] sm:$0x1] }
  0x14   : > { %1780 = vmatmul.mubr.msk.bf16.vlgmr.msra.gmra.mrb[0].mxu1 %vm273_vm1, %v1970_v12  ;;  %v1972_v14 = vld [vmem:[%s2085_s27 + $0x68] ss:$8 sps:$4 sm:$0xff]   ;;  %1820 = vmatmul.mubr.msk.bf16.vlgmr.msra.gmra.mrb[0].mxu0 %vm273_vm1, %v1971_v13  ;;  %v1973_v17 = vld [vmem:[%s2085_s27 + $0x78] ss:$8 sps:$4 sm:$0xff]   ;;  %v919_v24 = vshll.u32 %v1593_v19, 16  ;;  %v933_v27 = vshll.u32 %v1595_v21, 16 }
  0x15   : > { %1788 = vmatpush3.bf16.msra.mxu1 %v388_v6  ;;  %1828 = vmatpush3.bf16.msra.mxu0 %v1048_v7  ;;  %v1592_v18 = vld [vmem:[%s2085_s27 + $0x90] sm:$0xf]  ;;  %v1594_v20 = vld [vmem:[%s2085_s27 + $0x98] sm:$0xf]  ;;  %v1596_v28 = vld [vmem:[%s2085_s27 + $0xa0] sm:$0xf] }
  0x16   : > { %1783 = vmatprep.mubr.msk.bf16.mxu1 %vm273_vm1, %v1972_v14  ;;  %v910_v22 = vshrl.u32 %v1592_v18, 16  ;;  %v913_v23 = vshll.u32 %v1592_v18, 16  ;;  %v924_v25 = vshrl.u32 %v1594_v20, 16  ;;  %1940 = vmatprep.subr.msk.bf16.mxu0 %vm286_vm0, %v1693_v9  ;;  %v927_v26 = vshll.u32 %v1594_v20, 16  ;;  %v1597_v29 = vld [vmem:[%s2085_s27 + $0xa4] sm:$0x1] }
  0x17   : > { %1935 = vmatprep.subr.msk.bf16.mxu1 %vm286_vm0, %v1633_v10  ;;  %v921_v32 = vrot.slane %v919_v24, 5  ;;  %v1598_v34 = vld [vmem:[%s2085_s27 + $0xa8] sm:$0xf]  ;;  %v935_v36 = vrot.slane %v933_v27, 5  ;;  %v1599_v37 = vld [vmem:[%s2085_s27 + $0xac] sm:$0x1] }
  0x18   : > { %v912_v30 = vrot.slane %v910_v22, 4  ;;  %v915_v31 = vrot.slane %v913_v23, 5  ;;  %v926_v33 = vrot.slane %v924_v25, 4  ;;  %v929_v35 = vrot.slane %v927_v26, 5  ;;  %v206_v44 = vld [vmem:[%s2085_s27] sm:$0xf] }
  0x19   : > { %v938_v38 = vshrl.u32 %v1596_v28, 16  ;;  %v941_v39 = vshll.u32 %v1596_v28, 16  ;;  %v947_v41 = vshll.u32 %v1597_v29, 16  ;;  %v952_v42 = vshrl.u32 %v1598_v34, 16  ;;  %v208_v50 = vld [vmem:[%s2085_s27 + $0x8] sm:$0xf] }
  0x1a   : > { %v916_v40 = vor.u32 %v915_v31, %v912_v30  ;;  %v955_v43 = vshll.u32 %v1598_v34, 16  ;;  %v930_v46 = vor.u32 %v929_v35, %v926_v33  ;;  %v961_v49 = vshll.u32 %v1599_v37, 16  ;;  %v210_v63 = vld [vmem:[%s2085_s27 + $0x10] sm:$0xf]  ;;  %v212_v0 = vld [vmem:[%s2085_s27 + $0x18] sm:$0xf] }
  0x1b   : > { %v940_v47 = vrot.slane %v938_v38, 4  ;;  %v943_v48 = vrot.slane %v941_v39, 5  ;;  %v949_v52 = vrot.slane %v947_v41, 5  ;;  %v954_v53 = vrot.slane %v952_v42, 4  ;;  %v1600_v7 = vld [vmem:[%s2085_s27 + $0xb0] sm:$0xf] }
  0x1c   : > { %1784 = vmatmul.mubr.msk.bf16.gmra.mrb[4].mxu1 %vm273_vm1, %v1973_v17  ;;  %v917_v51 = vrot.slane %v916_v40, 4  ;;  %v957_v54 = vrot.slane %v955_v43, 5  ;;  %v931_v55 = vrot.slane %v930_v46, 4  ;;  %v963_v57 = vrot.slane %v961_v49, 5  ;;  %v1601_v12 = vld [vmem:[%s2085_s27 + $0xb4] sm:$0x1] }
  0x1d   : > { %v944_v56 = vor.u32 %v943_v48, %v940_v47  ;;  %v1625_v58 = vcombine.low %v206_v44, %v208_v50  ;;  %v459_v61 = vshrl.u32 %v206_v44, 16  ;;  %v462_v62 = vshll.u32 %v206_v44, 16  ;;  %v2147_v13 = vld [vmem:[%s2328_s1 + $0x6] sm:$0x3]  ;;  %v1602_v20 = vld [vmem:[%s2085_s27 + $0xb8] sm:$0xf] }
  0x1e   : > { %v922_v59 = vsel %vm2126_vm4, %v917_v51, %v921_v32  ;;  %v958_v60 = vor.u32 %v957_v54, %v954_v53  ;;  %v936_v2 = vsel %vm2126_vm4, %v931_v55, %v935_v36  ;;  %v473_v5 = vshrl.u32 %v208_v50, 16  ;;  %v1603_v21 = vld [vmem:[%s2085_s27 + $0xbc] sm:$0x1]  ;;  %v1604_v26 = vld [vmem:[%s2085_s27 + $0xc0] sm:$0xf] }
  0x1f   : > { %v945_v4 = vrot.slane %v944_v56, 4  ;;  %1789 = vmatprep.mubr.msk.bf16.mxu1 %vm273_vm1, %v1625_v58  ;;  %v476_v6 = vshll.u32 %v208_v50, 16  ;;  %v1677_v8 = vcombine.low %v922_v59, %v936_v2  ;;  %v2139_v10 = vrot.slane %v459_v61, 4  ;;  %v2164_v27 = vld [vmem:[%s2328_s1 + $0xe] sm:$0x3] }
  0x20   : > { %v959_v9 = vrot.slane %v958_v60, 4  ;;  %v2141_v11 = vrot.slane %v462_v62, 5  ;;  %v2151_v17 = vrot.slane %v473_v5, 4  ;;  %v1626_v19 = vcombine.low %v210_v63, %v212_v0  ;;  %v1605_v32 = vld [vmem:[%s2085_s27 + $0xc4] sm:$0x1] }
  0x21   : > { %v950_v14 = vsel %vm2126_vm4, %v945_v4, %v949_v52  ;;  %v2153_v18 = vrot.slane %v476_v6, 5  ;;  %1829 = vmatprep.mubr.msk.bf16.mxu0 %vm273_vm1, %v1677_v8  ;;  %v487_v23 = vshrl.u32 %v210_v63, 16  ;;  %v490_v24 = vshll.u32 %v210_v63, 16  ;;  %v1606_v37 = vld [vmem:[%s2085_s27 + $0xc8] sm:$0xf] }
  0x22   : > { %v964_v22 = vsel %vm2126_vm4, %v959_v9, %v963_v57  ;;  %v501_v25 = vshrl.u32 %v212_v0, 16  ;;  %v504_v29 = vshll.u32 %v212_v0, 16  ;;  %v966_v30 = vshrl.u32 %v1600_v7, 16  ;;  %v1607_v42 = vld [vmem:[%s2085_s27 + $0xcc] sm:$0x1] }
  0x23   : > { %v1678_v28 = vcombine.low %v950_v14, %v964_v22  ;;  %v969_v31 = vshll.u32 %v1600_v7, 16  ;;  %v2168_v33 = vrot.slane %v487_v23, 4  ;;  %v2170_v34 = vrot.slane %v490_v24, 5  ;;  %v214_v43 = vld [vmem:[%s2085_s27 + $0x20] sm:$0xf] }
  0x24   : > { %1790 = vmatmul.mubr.msk.bf16.vlgmr.msra.gmra.mrb[0].mxu1 %vm273_vm1, %v1626_v19  ;;  %v2172_v35 = vrot.slane %v501_v25, 4  ;;  %v975_v36 = vshll.u32 %v1601_v12, 16  ;;  %v2177_v38 = vrot.slane %v504_v29, 5  ;;  %v968_v39 = vrot.slane %v966_v30, 4  ;;  %v216_v48 = vld [vmem:[%s2085_s27 + $0x28] sm:$0xf] }
  0x25   : > { %1798 = vmatpush3.bf16.msra.mxu1 %v2108_v16  ;;  %1830 = vmatmul.mubr.msk.bf16.vlgmr.msra.gmra.mrb[0].mxu0 %vm273_vm1, %v1678_v28  ;;  %v971_v40 = vrot.slane %v969_v31, 5  ;;  %v980_v41 = vshrl.u32 %v1602_v20, 16  ;;  %v983_v46 = vshll.u32 %v1602_v20, 16  ;;  %v989_v16 = vshll.u32 %v1603_v21, 16  ;;  %v218_v6 = vld [vmem:[%s2085_s27 + $0x30] sm:$0xf] }
  0x26   : > { %1936 = vmatprep.subr.msk.bf16.mxu1 %vm286_vm0, %v2147_v13  ;;  %1838 = vmatpush3.bf16.msra.mxu0 %v2105_v15  ;;  %v977_v44 = vrot.slane %v975_v36, 5  ;;  %v994_v47 = vshrl.u32 %v1604_v26, 16  ;;  %v997_v51 = vshll.u32 %v1604_v26, 16  ;;  %v1003_v52 = vshll.u32 %v1605_v32, 16  ;;  %v220_v7 = vld [vmem:[%s2085_s27 + $0x38] sm:$0xf] }
  0x27   : > { %v972_v49 = vor.u32 %v971_v40, %v968_v39  ;;  %v982_v50 = vrot.slane %v980_v41, 4  ;;  %1941 = vmatprep.subr.msk.bf16.mxu0 %vm286_vm0, %v2164_v27  ;;  %v985_v53 = vrot.slane %v983_v46, 5  ;;  %v991_v54 = vrot.slane %v989_v16, 5  ;;  %v207_v28 = vld [vmem:[%s2085_s27 + $0x4] sm:$0x1] }
  0x28   : > { %v996_v55 = vrot.slane %v994_v47, 4  ;;  %v1008_v56 = vshrl.u32 %v1606_v37, 16  ;;  %v999_v15 = vrot.slane %v997_v51, 5  ;;  %v1005_v58 = vrot.slane %v1003_v52, 5  ;;  %v1978_v36 = vld [vmem:[%s2085_s27 + $0x8] ss:$8 sps:$4 sm:$0xff]  }
  0x29   : > { %v973_v57 = vrot.slane %v972_v49, 4  ;;  %v1011_v59 = vshll.u32 %v1606_v37, 16  ;;  %v986_v60 = vor.u32 %v985_v53, %v982_v50  ;;  %v1017_v62 = vshll.u32 %v1607_v42, 16  ;;  %v209_v37 = vld [vmem:[%s2085_s27 + $0xc] sm:$0x1] }
  0x2a   : > { %v1010_v61 = vrot.slane %v1008_v56, 4  ;;  %v1627_v63 = vcombine.low %v214_v43, %v216_v48  ;;  %v1000_v2 = vor.u32 %v999_v15, %v996_v55  ;;  %v515_v5 = vshrl.u32 %v214_v43, 16  ;;  %v211_v39 = vld [vmem:[%s2085_s27 + $0x14] sm:$0x1]  ;;  %v215_v53 = vld [vmem:[%s2085_s27 + $0x24] sm:$0x1] }
  0x2b   : > { %v978_v0 = vsel %vm2126_vm4, %v973_v57, %v977_v44  ;;  %v1013_v4 = vrot.slane %v1011_v59, 5  ;;  %v987_v8 = vrot.slane %v986_v60, 4  ;;  %v1019_v9 = vrot.slane %v1017_v62, 5  ;;  %v217_v15 = vld [vmem:[%s2085_s27 + $0x2c] sm:$0x1] }
  0x2c   : > { %1793 = vmatprep.mubr.msk.bf16.mxu1 %vm273_vm1, %v1627_v63  ;;  %v518_v12 = vshll.u32 %v214_v43, 16  ;;  %v529_v14 = vshrl.u32 %v216_v48, 16  ;;  %v1001_v19 = vrot.slane %v1000_v2, 4  ;;  %v517_v21 = vrot.slane %v515_v5, 4  ;;  %v1979_v62 = vld [vmem:[%s2085_s27 + $0x18] ss:$8 sps:$4 sm:$0xff]  }
  0x2d   : > { %v1014_v20 = vor.u32 %v1013_v4, %v1010_v61  ;;  %v532_v22 = vshll.u32 %v216_v48, 16  ;;  %v992_v23 = vsel %vm2126_vm4, %v987_v8, %v991_v54  ;;  %v1628_v26 = vcombine.low %v218_v6, %v220_v7  ;;  %v213_v48 = vld [vmem:[%s2085_s27 + $0x1c] sm:$0x1] }
  0x2e   : > { %v520_v24 = vrot.slane %v518_v12, 5  ;;  %v531_v25 = vrot.slane %v529_v14, 4  ;;  %v1679_v29 = vcombine.low %v978_v0, %v992_v23  ;;  %v1006_v30 = vsel %vm2126_vm4, %v1001_v19, %v1005_v58 }
  0x2f   : > { %v1015_v31 = vrot.slane %v1014_v20, 4  ;;  %v534_v32 = vrot.slane %v532_v22, 5  ;;  %1794 = vmatmul.mubr.msk.bf16.gmra.mrb[4].mxu1 %vm273_vm1, %v1628_v26  ;;  %v543_v40 = vshrl.u32 %v218_v6, 16  ;;  %v546_v41 = vshll.u32 %v218_v6, 16  ;;  %v1719_v22 = vld [vmem:[%s2328_s1 + $0x10] sm:$0x3] }
  0x30   : > { %v557_v42 = vshrl.u32 %v220_v7, 16  ;;  %v560_v43 = vshll.u32 %v220_v7, 16  ;;  %1833 = vmatprep.mubr.msk.bf16.mxu0 %vm273_vm1, %v1679_v29  ;;  %v465_v46 = vor.u32 %v2141_v11, %v2139_v10  ;;  %v468_v16 = vshll.u32 %v207_v28, 16 }
  0x31   : > { %v1020_v44 = vsel %vm2126_vm4, %v1015_v31, %v1019_v9  ;;  %v479_v47 = vor.u32 %v2153_v18, %v2151_v17  ;;  %v545_v50 = vrot.slane %v543_v40, 4  ;;  %v548_v51 = vrot.slane %v546_v41, 5  ;;  %v221_v9 = vld [vmem:[%s2085_s27 + $0x3c] sm:$0x1]  ;;  %v1981_v40 = vld [vmem:[%s2085_s27 + $0x38] ss:$8 sps:$4 sm:$0xff]  }
  0x32   : > { %v1680_v49 = vcombine.low %v1006_v30, %v1020_v44  ;;  %v559_v52 = vrot.slane %v557_v42, 4  ;;  %v562_v54 = vrot.slane %v560_v43, 5  ;;  %v466_v55 = vrot.slane %v465_v46, 4  ;;  %v1982_v44 = vld [vmem:[%s2085_s27 + $0x50] ss:$8 sps:$4 sm:$0xff]  }
  0x33   : > { %v470_v56 = vrot.slane %v468_v16, 5  ;;  %v480_v57 = vrot.slane %v479_v47, 4  ;;  %v482_v10 = vshll.u32 %v209_v37, 16  ;;  %v493_v11 = vor.u32 %v2170_v34, %v2168_v33  ;;  %v219_v33 = vld [vmem:[%s2085_s27 + $0x34] sm:$0x1] }
  0x34   : > { %1834 = vmatmul.mubr.msk.bf16.gmra.mrb[4].mxu0 %vm273_vm1, %v1680_v49  ;;  %v496_v17 = vshll.u32 %v211_v39, 16  ;;  %v507_v18 = vor.u32 %v2177_v38, %v2172_v35  ;;  %v510_v59 = vshll.u32 %v213_v48, 16  ;;  %v521_v60 = vor.u32 %v520_v24, %v517_v21  ;;  %v1984_v46 = vld [vmem:[%s2085_s27 + $0x90] ss:$8 sps:$4 sm:$0xff]   ;;  %v222_v16 = vld [vmem:[%s2085_s27 + $0x40] sm:$0xf] }
  0x35   : > { %1839 = vmatprep.mubr.msk.bf16.mxu0 %vm273_vm1, %v1978_v36  ;;  %v471_v58 = vsel %vm2126_vm4, %v466_v55, %v470_v56  ;;  %v524_v61 = vshll.u32 %v215_v53, 16  ;;  %v484_v63 = vrot.slane %v482_v10, 5  ;;  %v494_v0 = vrot.slane %v493_v11, 4  ;;  %v223_v47 = vld [vmem:[%s2085_s27 + $0x44] sm:$0x1] }
  0x36   : > { %v498_v2 = vrot.slane %v496_v17, 5  ;;  %v508_v4 = vrot.slane %v507_v18, 4  ;;  %v512_v34 = vrot.slane %v510_v59, 5  ;;  %v522_v5 = vrot.slane %v521_v60, 4  ;;  %v1985_v55 = vld [vmem:[%s2085_s27 + $0xa0] ss:$8 sps:$4 sm:$0xff]  }
  0x37   : > { %v526_v35 = vrot.slane %v524_v61, 5  ;;  %v535_v38 = vor.u32 %v534_v32, %v531_v25  ;;  %v2223_v6 = vsel %vm2126_vm4, %v480_v57, %v484_v63  ;;  %v538_v8 = vshll.u32 %v217_v15, 16  ;;  %v1980_v25 = vld [vmem:[%s2085_s27 + $0x28] ss:$8 sps:$4 sm:$0xff]   ;;  %v1990_v59 = vld [vmem:[%s2085_s27 + $0xf8] ss:$8 sps:$4 sm:$0xff]  }
  0x38   : > { %v2227_v7 = vsel %vm2126_vm4, %v494_v0, %v498_v2  ;;  %v549_v12 = vor.u32 %v548_v51, %v545_v50  ;;  %v1286_v14 = vsel %vm286_vm0, %v2164_v27, 0  ;;  %v1634_v19 = vcombine.low %v471_v58, %v2223_v6  ;;  %v1986_v10 = vld [vmem:[%s2085_s27 + $0x70] ss:$8 sps:$4 sm:$0xff]   ;;  %v1987_v18 = vld [vmem:[%s2085_s27 + $0x80] ss:$8 sps:$4 sm:$0xff]  }
  0x39   : > { %v2235_v20 = vsel %vm2126_vm4, %v508_v4, %v512_v34  ;;  %v536_v21 = vrot.slane %v535_v38, 4  ;;  %v715_v24 = vsel %vm286_vm0, %v2147_v13, 0  ;;  %v2247_v27 = vsel %vm2126_vm4, %v522_v5, %v526_v35  ;;  %v1988_v11 = vld [vmem:[%s2085_s27 + $0xb0] ss:$8 sps:$4 sm:$0xff]   ;;  %v1989_v15 = vld [vmem:[%s2085_s27 + $0xc0] ss:$8 sps:$4 sm:$0xff]  }
  0x3a   : > { %v1635_v23 = vcombine.low %v2227_v7, %v2235_v20  ;;  %v540_v26 = vrot.slane %v538_v8, 5  ;;  %1799 = vmatprep.mubr.msk.bf16.mxu1 %vm273_vm1, %v1634_v19  ;;  %v550_v28 = vrot.slane %v549_v12, 4  ;;  %v552_v29 = vshll.u32 %v219_v33, 16  ;;  %v1991_v60 = vld [vmem:[%s2085_s27 + $0x108] ss:$8 sps:$4 sm:$0xff]  }
  0x3b   : > { %v563_v30 = vor.u32 %v562_v54, %v559_v52  ;;  %v566_v31 = vshll.u32 %v221_v9, 16  ;;  %v1362_v48 = vshrl.u32 %v222_v16, 16  ;;  %v1365_v49 = vshll.u32 %v222_v16, 16  ;;  %v1983_v54 = vld [vmem:[%s2085_s27 + $0x60] ss:$8 sps:$4 sm:$0xff]  }
  0x3c   : > { %1840 = vmatmul.mubr.msk.bf16.vlgmr.msra.gmra.mrb[0].mxu0 %vm273_vm1, %v1979_v62  ;;  %1800 = vmatmul.mubr.msk.bf16.vlgmr.msra.gmra.mrb[0].mxu1 %vm273_vm1, %v1635_v23  ;;  %v541_v13 = vsel %vm2126_vm4, %v536_v21, %v540_v26  ;;  %v554_v36 = vrot.slane %v552_v29, 5  ;;  %v1371_v50 = vshll.u32 %v223_v47, 16  ;;  %v1395_v57 = vsel %vm286_vm0, %v1719_v22, 0  ;;  %v1728_v33 = vld [vmem:[%s2329_s2] ss:$0 sm:$0xff] }
  0x3d   : > { %1848 = vmatpush3.bf16.msra.mxu0 %v1286_v14  ;;  %1808 = vmatpush3.bf16.msra.mxu1 %v715_v24  ;;  %v1636_v32 = vcombine.low %v2247_v27, %v541_v13  ;;  %v564_v37 = vrot.slane %v563_v30, 4  ;;  %v568_v39 = vrot.slane %v566_v31, 5  ;;  %v1367_v51 = vrot.slane %v1365_v49, 5 }
  0x3e   : > { %1843 = vmatprep.mubr.msk.bf16.mxu0 %vm273_vm1, %v1980_v25  ;;  %1942 = vmatprep.subr.msk.bf16.mxu0 %vm286_vm0, %v1719_v22  ;;  %v555_v41 = vsel %vm2126_vm4, %v550_v28, %v554_v36  ;;  %v1373_v53 = vrot.slane %v1371_v50, 5  ;;  %v1720_v58 = vcombine.low %v2223_v6, %v2227_v7 }
  0x3f   : > { %1803 = vmatprep.mubr.msk.bf16.mxu1 %vm273_vm1, %v1636_v32  ;;  %v569_v42 = vsel %vm2126_vm4, %v564_v37, %v568_v39  ;;  %1938 = vmatprep.subr.msk.bf16.mxu1 %vm286_vm0, %v2060_v1  ;;  %v1364_v1 = vrot.slane %v1362_v48, 4  ;;  %v1722_v45 = vcombine.low %v541_v13, %v555_v41 }
  0x40   : > { %v1637_v43 = vcombine.low %v555_v41, %v569_v42 }
  0x41   : > { %v1368_v52 = vor.u32 %v1367_v51, %v1364_v1 }
  0x43   : > { %v1369_v56 = vrot.slane %v1368_v52, 4 }
  0x44   : > { %1844 = vmatmul.mubr.msk.bf16.gmra.mrb[4].mxu0 %vm273_vm1, %v1981_v40  ;;  %1804 = vmatmul.mubr.msk.bf16.gmra.mrb[4].mxu1 %vm273_vm1, %v1637_v43 }
  0x45   : > { %1849 = vmatprep.mubr.msk.bf16.mxu0 %vm273_vm1, %v1982_v44  ;;  %1809 = vmatprep.mubr.msk.bf16.mxu1 %vm273_vm1, %v1984_v46  ;;  %v1374_v17 = vsel %vm2126_vm4, %v1369_v56, %v1373_v53 }
  0x46   : > { %v1723_v61 = vcombine.low %v569_v42, %v1374_v17 }
  0x4c   : > { %1850 = vmatmul.mubr.msk.bf16.vlgmr.msra.gmra.mrb[0].mxu0 %vm273_vm1, %v1983_v54  ;;  %1810 = vmatmul.mubr.msk.bf16.vlgmr.msra.gmra.mrb[0].mxu1 %vm273_vm1, %v1985_v55 }
  0x4d   : > { %1858 = vmatpush3.bf16.msra.mxu0 %v1395_v57  ;;  %1868 = vmatpush3.bf16.msra.mxu1 %v2068_v3  ;;  %v1721_v3 = vcombine.low %v2235_v20, %v2247_v27 }
  0x4e   : > { %1853 = vmatprep.mubr.msk.bf16.mxu0 %vm273_vm1, %v1986_v10  ;;  %1813 = vmatprep.mubr.msk.bf16.mxu1 %vm273_vm1, %v1988_v11 }
  0x54   : > { %1854 = vmatmul.mubr.msk.bf16.gmra.mrb[4].mxu0 %vm273_vm1, %v1987_v18  ;;  %1814 = vmatmul.mubr.msk.bf16.gmra.mrb[4].mxu1 %vm273_vm1, %v1989_v15 }
  0x55   : > { %1859 = vmatprep.mubr.msk.bf16.mxu0 %vm273_vm1, %v1720_v58  ;;  %1823 = vmatprep.mubr.msk.bf16.mxu1 %vm273_vm1, %v1990_v59 }
  0x5c   : > { %1860 = vmatmul.mubr.msk.bf16.vlgmr.msra.gmra.mrb[0].mxu0 %vm273_vm1, %v1721_v3 }
  0x5d   : > { %1863 = vmatprep.mubr.msk.bf16.mxu0 %vm273_vm1, %v1722_v45 }
  0x60   : > { %1824 = vmatmul.mubr.msk.bf16.vlgmr.msra.gmra.mrb[4].mxu1 %vm273_vm1, %v1991_v60 }
  0x64   : > { %1864 = vmatmul.mubr.msk.bf16.gmra.mrb[4].mxu0 %vm273_vm1, %v1723_v61 }
 0x11f   : > { %v1811_v62 = vpop.f32.mrb[0].mxu1 }
 0x120   : > { %v751_v63 = vpop.f32.mrb[1].mxu1 }
 0x121   : > { %v1812_v0 = vpop.f32.mrb[2].mxu1 }
 0x122   : > { %v754_v2 = vpop.f32.mrb[3].mxu1 }
 0x12f   : > { %v1861_v4 = vpop.f32.mrb[0].mxu0 }
 0x130   : > { %v1869_v34 = vadd.f32 %v1861_v4, %v1811_v62  ;;  %v1431_v5 = vpop.f32.mrb[1].mxu0 }
 0x131   : > { %v1870_v35 = vadd.f32 %v1431_v5, %v751_v63  ;;  %v1862_v38 = vpop.f32.mrb[2].mxu0 }
 0x132   : > { %v1479_v6 = vadd.f32 %v1869_v34, %v1728_v33  ;;  %v1871_v7 = vadd.f32 %v1862_v38, %v1812_v0  ;;  %v1434_v8 = vpop.f32.mrb[3].mxu0 }
 0x133   : > { %v1477_v9 = vadd.f32 %v1870_v35, %v1728_v33  ;;  %v1872_v12 = vadd.f32 %v1434_v8, %v754_v2  ;;  %v1825_v14 = vpop.f32.mrb[4].mxu1 }
 0x134   : > { %1487 = vst [vmem:[%s2308_s20 + $0x10] sm:$0xff] %v1479_v6  ;;  %v1480_v19 = vadd.f32 %v1871_v7, %v1728_v33  ;;  %v886_v20 = vpop.f32.mrb[5].mxu1 }
 0x135   : > { %1485 = vst [vmem:[%s2308_s20] sm:$0xff] %v1477_v9  ;;  %v1478_v21 = vadd.f32 %v1872_v12, %v1728_v33  ;;  %v1826_v22 = vpop.f32.mrb[6].mxu1 }
 0x136   : > { %1488 = vst [vmem:[%s2308_s20 + $0x18] sm:$0xff] %v1480_v19  ;;  %v889_v23 = vpop.f32.mrb[7].mxu1 }
 0x137   : > { %1486 = vst [vmem:[%s2308_s20 + $0x8] sm:$0xff] %v1478_v21  ;;  %v1865_v24 = vpop.f32.mrb[4].mxu0 }
 0x138   : > { %v1873_v25 = vadd.f32 %v1865_v24, %v1825_v14  ;;  %v1447_v27 = vpop.f32.mrb[5].mxu0 }
 0x139   : > { %v1874_v26 = vadd.f32 %v1447_v27, %v886_v20  ;;  %v1866_v28 = vpop.f32.mrb[6].mxu0 }
 0x13a   : > { %v1483_v29 = vadd.f32 %v1873_v25, %v1728_v33  ;;  %v1875_v30 = vadd.f32 %v1866_v28, %v1826_v22  ;;  %v1450_v31 = vpop.f32.mrb[7].mxu0 }
 0x13b   : > { %v1481_v13 = vadd.f32 %v1874_v26, %v1728_v33  ;;  %v1876_v32 = vadd.f32 %v1450_v31, %v889_v23 }
 0x13c   : > { %1491 = vst [vmem:[%s2308_s20 + $0x30] sm:$0xff] %v1483_v29  ;;  %v1484_v36 = vadd.f32 %v1875_v30, %v1728_v33 }
 0x13d   : > { %1489 = vst [vmem:[%s2308_s20 + $0x20] sm:$0xff] %v1481_v13  ;;  %v1482_v37 = vadd.f32 %v1876_v32, %v1728_v33 }
 0x13e   : > { %1492 = vst [vmem:[%s2308_s20 + $0x38] sm:$0xff] %v1484_v36 }
 0x13f   : > { %1490 = vst [vmem:[%s2308_s20 + $0x28] sm:$0xff] %v1482_v37 }
 0x140 PF: > { %s13_s14 = sadd.s32 1, %s2014_s14   ;;  %s2333_s12 = smov %s2010_s13 }
 0x141   : > { %p10_p5 = scmp.ge.s32.totalorder %s13_s14, 4   ;;  %s2334_s13 = smov %s2336_s15 }
 0x143   :  { %12 = sbr.rel (!%p10_p5) target bundleno = 2 (0x2), region = 78 }

</bundles_post_ra>
